<compile_context>
chip_gen: v7x
topology: tpu7x:2x2x1
jax: 0.10.0
libtpu: 0.0.40
codegen_flags: <defaults>
</compile_context>

<pallas_src>
import functools

import jax
import jax.numpy as jnp
from jax.experimental import pallas as pl
from jax.experimental.pallas import tpu as pltpu

_LANE = 128
_TILE_ALIGN = 16  # sublane alignment covering bf16 (2 rows / sublane) packing


def _round_up(x, m):
    return ((x + m - 1) // m) * m


def _apply_activation(x, name):
    """Elementwise activation, computed in f32."""
    if name == 'none':
        return x
    if name == 'relu':
        return jnp.maximum(x, 0.0)
    if name == 'leaky_relu':
        # Matches nn.LeakyReLU(0.2) used by the SRVP activation_factory.
        return jnp.where(x >= 0.0, x, 0.2 * x)
    if name == 'elu':
        # Clamp before exp so large positive x never hits the EUP.
        return jnp.where(x >= 0.0, x, jnp.exp(jnp.minimum(x, 0.0)) - 1.0)
    if name == 'sigmoid':
        return jax.nn.sigmoid(x)
    if name == 'tanh':
        return jnp.tanh(x)
    raise ValueError(f"Activation function '{name}' not yet implemented")


def mlp_fused_kernel(x_ref, *refs, activation, n_layers):
    """Entire MLP for one batch tile.

    refs = (w0, b0, w1, b1, ..., w_{L-1}, b_{L-1}, o_ref).
    Weights are zero-padded to 128-lane multiples, so padded input columns /
    padded hidden activations contribute nothing to the real output columns.
    """
    o_ref = refs[2 * n_layers]
    h = x_ref[...]  # (tb, d_in_pad) bf16
    for il in range(n_layers):  # L is static -> fully unrolled
        w_ref = refs[2 * il]
        b_ref = refs[2 * il + 1]
        if il > 0:
            h = _apply_activation(h, activation)  # f32 elementwise
        # bf16 MXU inputs, f32 accumulation; bias is a (1, d_out_pad) f32 row.
        h = jnp.dot(h.astype(jnp.bfloat16), w_ref[...],
                    preferred_element_type=jnp.float32) + b_ref[...]
    o_ref[...] = h.astype(o_ref.dtype)


def prepare_mlp_params(params):
    """One-time prep: pad every feature dim to 128 lanes, weights -> bf16.

    `params` is a list of (W, b) with W of shape (n_in_l, n_out_l) (already
    transposed vs. PyTorch) and b of shape (1, n_out_l). Returns
    (padded_params, n_inp, n_out) to be reused across every forward call.
    """
    padded = []
    for (w, b) in params:
        d_in, d_out = w.shape
        d_in_p, d_out_p = _round_up(d_in, _LANE), _round_up(d_out, _LANE)
        w_p = jnp.zeros((d_in_p, d_out_p), jnp.bfloat16)
        w_p = w_p.at[:d_in, :d_out].set(w.astype(jnp.bfloat16))
        b_p = jnp.zeros((1, d_out_p), jnp.float32)
        b_p = b_p.at[:, :d_out].set(b.astype(jnp.float32))
        padded.append((w_p, b_p))
    n_inp = params[0][0].shape[0]
    n_out = params[-1][0].shape[1]
    return padded, n_inp, n_out


def mlp_forward(x, prepared, activation='relu', batch_tile=512):
    """Forward pass: (batch, n_inp) -> (batch, n_out), one fused pallas_call."""
    padded, n_inp, n_out = prepared
    B = x.shape[0]
    assert x.shape[1] == n_inp
    n_layers = len(padded)
    d_in0_p = padded[0][0].shape[0]
    d_outL_p = padded[-1][0].shape[1]

    # Input: cast to bf16 (halves its DMA); pad features only when needed.
    # Batch dim stays ragged (no pre-pad copy) — partial blocks are masked.
    if n_inp == d_in0_p:
        x_p = x.astype(jnp.bfloat16)
    else:
        x_p = jnp.zeros((B, d_in0_p), jnp.bfloat16)
        x_p = x_p.at[:, :n_inp].set(x.astype(jnp.bfloat16))

    # Batch tile: aligned for bf16 sublane packing; keep >= 2 grid steps when
    # possible so the "parallel" axis can use both v7x TensorCores.
    tb = min(_round_up(batch_tile, _TILE_ALIGN), _round_up(B, _TILE_ALIGN))
    if pl.cdiv(B, tb) == 1 and tb > _TILE_ALIGN:
        half = _round_up((tb + 1) // 2, _TILE_ALIGN)
        if pl.cdiv(B, half) >= 2:
            tb = half
    grid = (pl.cdiv(B, tb),)

    flat_inputs = [x_p]
    for (w_p, b_p) in padded:
        flat_inputs.append(w_p)
        flat_inputs.append(b_p)

    kernel = functools.partial(
        mlp_fused_kernel, activation=activation, n_layers=n_layers)

    max_feat_p = max(max(w.shape[0], w.shape[1]) for (w, _) in padded)

    def _run(single_buffer_weights):
        in_specs = [pl.BlockSpec((tb, d_in0_p), lambda i: (i, 0))]
        for (w_p, b_p) in padded:
            # Same block every grid step -> weight/bias stay VMEM-resident.
            kw = ({'pipeline_mode': pl.Buffered(1)}
                  if single_buffer_weights else {})
            in_specs.append(pl.BlockSpec(w_p.shape, lambda i: (0, 0), **kw))
            in_specs.append(pl.BlockSpec(b_p.shape, lambda i: (0, 0), **kw))

        # VMEM budget: double-buffered x/out tiles + (single|double)-buffered
        # weight stack + live f32 activation, with ~25% headroom.
        # NOTE: very large weight stacks (> ~VMEM/TC) would need an inner
        # K/N pipeline instead of the all-resident design used here.
        w_buf = 1 if single_buffer_weights else 2
        bytes_w = w_buf * sum(w.size * w.dtype.itemsize + b.size * 4
                              for (w, b) in padded)
        bytes_x = 2 * tb * d_in0_p * 2
        bytes_o = 2 * tb * d_outL_p * 4
        bytes_act = 2 * tb * max_feat_p * 4
        vmem_limit = int(min(max((bytes_w + bytes_x + bytes_o + bytes_act)
                                 * 1.25, 16 * 2 ** 20), 64 * 2 ** 20))

        return pl.pallas_call(
            kernel,
            out_shape=jax.ShapeDtypeStruct((B, d_outL_p), jnp.float32),
            grid=grid,
            in_specs=in_specs,
            out_specs=pl.BlockSpec((tb, d_outL_p), lambda i: (i, 0)),
            compiler_params=pltpu.CompilerParams(
                dimension_semantics=("parallel",),
                vmem_limit_bytes=vmem_limit),
        )(*flat_inputs)

    try:
        out_p = _run(True)
    except Exception:
        # Fallback if this JAX/Mosaic version rejects Buffered(1) specs.
        out_p = _run(False)

    if d_outL_p == n_out:
        return out_p
    return out_p[:, :n_out]


def init_mlp_params(key, n_inp, n_hid, n_out, n_layers):
    """Deterministic parameter init mirroring the PyTorch module's shapes.

    Returns a list of (W, b) with W of shape (n_in_l, n_out_l) (already
    transposed vs. PyTorch's (n_out_l, n_in_l)) and b of shape (1, n_out_l).
    """
    assert n_hid == 0 or n_layers > 1
    params = []
    for il in range(n_layers):
        d_in = n_inp if il == 0 else n_hid
        d_out = n_out if il == n_layers - 1 else n_hid
        key, kw, kb = jax.random.split(key, 3)
        bound = 1.0 / jnp.sqrt(d_in)  # same scale as nn.Linear default init
        w = jax.random.uniform(kw, (d_in, d_out), jnp.float32, -bound, bound)
        b = jax.random.uniform(kb, (1, d_out), jnp.float32, -bound, bound)
        params.append((w, b))
    return params


def mlp_reference(x, params, activation='relu'):
    """Pure f32 JAX reference matching the PyTorch module semantics."""
    h = x
    for il, (w, b) in enumerate(params):
        act = 'none' if il == 0 else activation
        h = _apply_activation(h, act)
        h = h @ w + b
    return h


if __name__ == "__main__":
    # Small shapes consistent with forward(x: (batch, n_inp)) -> (batch, n_out).
    batch, n_inp, n_hid, n_out, n_layers = 8, 32, 64, 16, 3
    activation = 'relu'

    key = jax.random.PRNGKey(0)
    key, kx = jax.random.split(key)
    x = jax.random.normal(kx, (batch, n_inp), jnp.float32)

    params = init_mlp_params(key, n_inp, n_hid, n_out, n_layers)
    prepared = prepare_mlp_params(params)  # one-time pad + bf16 conversion

    out = mlp_forward(x, prepared, activation)
    out = jax.block_until_ready(out)

    ref = mlp_reference(x, params, activation)
    assert out.shape == (batch, n_out)
    # bf16 MXU inputs (f32 accumulation) -> looser tolerance vs the f32 ref.
    assert jnp.allclose(out, ref, atol=5e-2, rtol=5e-2), \
        "mismatch vs JAX reference"

    print("KERNEL_OK")
</pallas_src>

<mosaic_0001>
module attributes {stable_mosaic.version = 11 : i64} {
  func.func @mlp_fused_kernel(%arg0: i32, %arg1: memref<16x128xbf16, #tpu.memory_space<vmem>>, %arg2: memref<128x128xbf16, #tpu.memory_space<vmem>>, %arg3: memref<1x128xf32, #tpu.memory_space<vmem>>, %arg4: memref<128x128xbf16, #tpu.memory_space<vmem>>, %arg5: memref<1x128xf32, #tpu.memory_space<vmem>>, %arg6: memref<128x128xbf16, #tpu.memory_space<vmem>>, %arg7: memref<1x128xf32, #tpu.memory_space<vmem>>, %arg8: memref<16x128xf32, #tpu.memory_space<vmem>>) attributes {dimension_semantics = [#tpu.dimension_semantics<parallel>], iteration_bounds = array<i64: 1>, scalar_prefetch = 0 : i64, scratch_operands = 0 : i64, tpu.core_type = #tpu.core_type<tc>, window_params = [{transform_indices = @transform_0, window_bounds = array<i64: 16, 128>}, {pipeline_mode = #tpu.pipeline_mode<synchronous>, transform_indices = @transform_1, window_bounds = array<i64: 128, 128>}, {pipeline_mode = #tpu.pipeline_mode<synchronous>, transform_indices = @transform_2, window_bounds = array<i64: 1, 128>}, {pipeline_mode = #tpu.pipeline_mode<synchronous>, transform_indices = @transform_3, window_bounds = array<i64: 128, 128>}, {pipeline_mode = #tpu.pipeline_mode<synchronous>, transform_indices = @transform_4, window_bounds = array<i64: 1, 128>}, {pipeline_mode = #tpu.pipeline_mode<synchronous>, transform_indices = @transform_5, window_bounds = array<i64: 128, 128>}, {pipeline_mode = #tpu.pipeline_mode<synchronous>, transform_indices = @transform_6, window_bounds = array<i64: 1, 128>}, {transform_indices = @transform_7, window_bounds = array<i64: 16, 128>}]} {
    %c0 = arith.constant 0 : index
    %c0_0 = arith.constant 0 : index
    %0 = vector.load %arg1[%c0, %c0_0] : memref<16x128xbf16, #tpu.memory_space<vmem>>, vector<16x128xbf16>
    %c0_1 = arith.constant 0 : index
    %c0_2 = arith.constant 0 : index
    %1 = vector.load %arg2[%c0_1, %c0_2] : memref<128x128xbf16, #tpu.memory_space<vmem>>, vector<128x128xbf16>
    %cst = arith.constant dense<0.000000e+00> : vector<16x128xf32>
    %2 = tpu.matmul %0, %1, %cst {dimension_numbers = #tpu.dot_dimension_numbers<[1], [0], [0], [1], [0, 0, 1, 1], [], []>} : vector<16x128xbf16>, vector<128x128xbf16>, vector<16x128xf32> -> vector<16x128xf32>
    %c0_3 = arith.constant 0 : index
    %c0_4 = arith.constant 0 : index
    %3 = vector.load %arg3[%c0_3, %c0_4] : memref<1x128xf32, #tpu.memory_space<vmem>>, vector<1x128xf32>
    %4 = vector.broadcast %3 : vector<1x128xf32> to vector<16x128xf32>
    %5 = arith.addf %2, %4 : vector<16x128xf32>
    %cst_5 = arith.constant 0.000000e+00 : f32
    %6 = vector.broadcast %cst_5 : f32 to vector<16x128xf32>
    %7 = arith.maximumf %5, %6 : vector<16x128xf32>
    %8 = arith.truncf %7 : vector<16x128xf32> to vector<16x128xbf16>
    %c0_6 = arith.constant 0 : index
    %c0_7 = arith.constant 0 : index
    %9 = vector.load %arg4[%c0_6, %c0_7] : memref<128x128xbf16, #tpu.memory_space<vmem>>, vector<128x128xbf16>
    %cst_8 = arith.constant dense<0.000000e+00> : vector<16x128xf32>
    %10 = tpu.matmul %8, %9, %cst_8 {dimension_numbers = #tpu.dot_dimension_numbers<[1], [0], [0], [1], [0, 0, 1, 1], [], []>} : vector<16x128xbf16>, vector<128x128xbf16>, vector<16x128xf32> -> vector<16x128xf32>
    %c0_9 = arith.constant 0 : index
    %c0_10 = arith.constant 0 : index
    %11 = vector.load %arg5[%c0_9, %c0_10] : memref<1x128xf32, #tpu.memory_space<vmem>>, vector<1x128xf32>
    %12 = vector.broadcast %11 : vector<1x128xf32> to vector<16x128xf32>
    %13 = arith.addf %10, %12 : vector<16x128xf32>
    %cst_11 = arith.constant 0.000000e+00 : f32
    %14 = vector.broadcast %cst_11 : f32 to vector<16x128xf32>
    %15 = arith.maximumf %13, %14 : vector<16x128xf32>
    %16 = arith.truncf %15 : vector<16x128xf32> to vector<16x128xbf16>
    %c0_12 = arith.constant 0 : index
    %c0_13 = arith.constant 0 : index
    %17 = vector.load %arg6[%c0_12, %c0_13] : memref<128x128xbf16, #tpu.memory_space<vmem>>, vector<128x128xbf16>
    %cst_14 = arith.constant dense<0.000000e+00> : vector<16x128xf32>
    %18 = tpu.matmul %16, %17, %cst_14 {dimension_numbers = #tpu.dot_dimension_numbers<[1], [0], [0], [1], [0, 0, 1, 1], [], []>} : vector<16x128xbf16>, vector<128x128xbf16>, vector<16x128xf32> -> vector<16x128xf32>
    %c0_15 = arith.constant 0 : index
    %c0_16 = arith.constant 0 : index
    %19 = vector.load %arg7[%c0_15, %c0_16] : memref<1x128xf32, #tpu.memory_space<vmem>>, vector<1x128xf32>
    %20 = vector.broadcast %19 : vector<1x128xf32> to vector<16x128xf32>
    %21 = arith.addf %18, %20 : vector<16x128xf32>
    %c0_17 = arith.constant 0 : index
    %c0_18 = arith.constant 0 : index
    %22 = vector.load %arg8[%c0_17, %c0_18] : memref<16x128xf32, #tpu.memory_space<vmem>>, vector<16x128xf32>
    tpu.vector_store %arg8[%c0_17, %c0_18], %21 {strides = array<i32>} : memref<16x128xf32, #tpu.memory_space<vmem>>, vector<16x128xf32>,
    return
  }
  func.func @transform_0(%arg0: i32) -> (i32, i32) {
    %c0_i32 = arith.constant 0 : i32
    %c0_i32_0 = arith.constant 0 : i32
    return %arg0, %c0_i32 : i32, i32
  }
  func.func @transform_1(%arg0: i32) -> (i32, i32) {
    %c0_i32 = arith.constant 0 : i32
    %c0_i32_0 = arith.constant 0 : i32
    %c0_i32_1 = arith.constant 0 : i32
    return %c0_i32, %c0_i32_0 : i32, i32
  }
  func.func @transform_2(%arg0: i32) -> (i32, i32) {
    %c0_i32 = arith.constant 0 : i32
    %c0_i32_0 = arith.constant 0 : i32
    %c0_i32_1 = arith.constant 0 : i32
    return %c0_i32, %c0_i32_0 : i32, i32
  }
  func.func @transform_3(%arg0: i32) -> (i32, i32) {
    %c0_i32 = arith.constant 0 : i32
    %c0_i32_0 = arith.constant 0 : i32
    %c0_i32_1 = arith.constant 0 : i32
    return %c0_i32, %c0_i32_0 : i32, i32
  }
  func.func @transform_4(%arg0: i32) -> (i32, i32) {
    %c0_i32 = arith.constant 0 : i32
    %c0_i32_0 = arith.constant 0 : i32
    %c0_i32_1 = arith.constant 0 : i32
    return %c0_i32, %c0_i32_0 : i32, i32
  }
  func.func @transform_5(%arg0: i32) -> (i32, i32) {
    %c0_i32 = arith.constant 0 : i32
    %c0_i32_0 = arith.constant 0 : i32
    %c0_i32_1 = arith.constant 0 : i32
    return %c0_i32, %c0_i32_0 : i32, i32
  }
  func.func @transform_6(%arg0: i32) -> (i32, i32) {
    %c0_i32 = arith.constant 0 : i32
    %c0_i32_0 = arith.constant 0 : i32
    %c0_i32_1 = arith.constant 0 : i32
    return %c0_i32, %c0_i32_0 : i32, i32
  }
  func.func @transform_7(%arg0: i32) -> (i32, i32) {
    %c0_i32 = arith.constant 0 : i32
    %c0_i32_0 = arith.constant 0 : i32
    return %arg0, %c0_i32 : i32, i32
  }
}

module attributes {stable_mosaic.version = 11 : i64} {
  func.func @mlp_fused_kernel(%arg0: i32, %arg1: memref<16x128xbf16, #tpu.memory_space<vmem>>, %arg2: memref<128x128xbf16, #tpu.memory_space<vmem>>, %arg3: memref<1x128xf32, #tpu.memory_space<vmem>>, %arg4: memref<128x128xbf16, #tpu.memory_space<vmem>>, %arg5: memref<1x128xf32, #tpu.memory_space<vmem>>, %arg6: memref<128x128xbf16, #tpu.memory_space<vmem>>, %arg7: memref<1x128xf32, #tpu.memory_space<vmem>>, %arg8: memref<16x128xf32, #tpu.memory_space<vmem>>) attributes {dimension_semantics = [#tpu.dimension_semantics<parallel>], iteration_bounds = array<i64: 1>, scalar_prefetch = 0 : i64, scratch_operands = 0 : i64, tpu.core_type = #tpu.core_type<tc>, window_params = [{transform_indices = @transform_0, window_bounds = array<i64: 16, 128>}, {pipeline_mode = #tpu.pipeline_mode<synchronous>, transform_indices = @transform_1, window_bounds = array<i64: 128, 128>}, {pipeline_mode = #tpu.pipeline_mode<synchronous>, transform_indices = @transform_2, window_bounds = array<i64: 1, 128>}, {pipeline_mode = #tpu.pipeline_mode<synchronous>, transform_indices = @transform_3, window_bounds = array<i64: 128, 128>}, {pipeline_mode = #tpu.pipeline_mode<synchronous>, transform_indices = @transform_4, window_bounds = array<i64: 1, 128>}, {pipeline_mode = #tpu.pipeline_mode<synchronous>, transform_indices = @transform_5, window_bounds = array<i64: 128, 128>}, {pipeline_mode = #tpu.pipeline_mode<synchronous>, transform_indices = @transform_6, window_bounds = array<i64: 1, 128>}, {transform_indices = @transform_7, window_bounds = array<i64: 16, 128>}]} {
    %c0 = arith.constant 0 : index
    %c0_0 = arith.constant 0 : index
    %0 = vector.load %arg1[%c0, %c0_0] : memref<16x128xbf16, #tpu.memory_space<vmem>>, vector<16x128xbf16>
    %c0_1 = arith.constant 0 : index
    %c0_2 = arith.constant 0 : index
    %1 = vector.load %arg2[%c0_1, %c0_2] : memref<128x128xbf16, #tpu.memory_space<vmem>>, vector<128x128xbf16>
    %cst = arith.constant dense<0.000000e+00> : vector<16x128xf32>
    %2 = tpu.matmul %0, %1, %cst {dimension_numbers = #tpu.dot_dimension_numbers<[1], [0], [0], [1], [0, 0, 1, 1], [], []>} : vector<16x128xbf16>, vector<128x128xbf16>, vector<16x128xf32> -> vector<16x128xf32>
    %c0_3 = arith.constant 0 : index
    %c0_4 = arith.constant 0 : index
    %3 = vector.load %arg3[%c0_3, %c0_4] : memref<1x128xf32, #tpu.memory_space<vmem>>, vector<1x128xf32>
    %4 = vector.broadcast %3 : vector<1x128xf32> to vector<16x128xf32>
    %5 = arith.addf %2, %4 : vector<16x128xf32>
    %cst_5 = arith.constant 0.000000e+00 : f32
    %6 = vector.broadcast %cst_5 : f32 to vector<16x128xf32>
    %7 = arith.maximumf %5, %6 : vector<16x128xf32>
    %8 = arith.truncf %7 : vector<16x128xf32> to vector<16x128xbf16>
    %c0_6 = arith.constant 0 : index
    %c0_7 = arith.constant 0 : index
    %9 = vector.load %arg4[%c0_6, %c0_7] : memref<128x128xbf16, #tpu.memory_space<vmem>>, vector<128x128xbf16>
    %cst_8 = arith.constant dense<0.000000e+00> : vector<16x128xf32>
    %10 = tpu.matmul %8, %9, %cst_8 {dimension_numbers = #tpu.dot_dimension_numbers<[1], [0], [0], [1], [0, 0, 1, 1], [], []>} : vector<16x128xbf16>, vector<128x128xbf16>, vector<16x128xf32> -> vector<16x128xf32>
    %c0_9 = arith.constant 0 : index
    %c0_10 = arith.constant 0 : index
    %11 = vector.load %arg5[%c0_9, %c0_10] : memref<1x128xf32, #tpu.memory_space<vmem>>, vector<1x128xf32>
    %12 = vector.broadcast %11 : vector<1x128xf32> to vector<16x128xf32>
    %13 = arith.addf %10, %12 : vector<16x128xf32>
    %cst_11 = arith.constant 0.000000e+00 : f32
    %14 = vector.broadcast %cst_11 : f32 to vector<16x128xf32>
    %15 = arith.maximumf %13, %14 : vector<16x128xf32>
    %16 = arith.truncf %15 : vector<16x128xf32> to vector<16x128xbf16>
    %c0_12 = arith.constant 0 : index
    %c0_13 = arith.constant 0 : index
    %17 = vector.load %arg6[%c0_12, %c0_13] : memref<128x128xbf16, #tpu.memory_space<vmem>>, vector<128x128xbf16>
    %cst_14 = arith.constant dense<0.000000e+00> : vector<16x128xf32>
    %18 = tpu.matmul %16, %17, %cst_14 {dimension_numbers = #tpu.dot_dimension_numbers<[1], [0], [0], [1], [0, 0, 1, 1], [], []>} : vector<16x128xbf16>, vector<128x128xbf16>, vector<16x128xf32> -> vector<16x128xf32>
    %c0_15 = arith.constant 0 : index
    %c0_16 = arith.constant 0 : index
    %19 = vector.load %arg7[%c0_15, %c0_16] : memref<1x128xf32, #tpu.memory_space<vmem>>, vector<1x128xf32>
    %20 = vector.broadcast %19 : vector<1x128xf32> to vector<16x128xf32>
    %21 = arith.addf %18, %20 : vector<16x128xf32>
    %c0_17 = arith.constant 0 : index
    %c0_18 = arith.constant 0 : index
    %22 = vector.load %arg8[%c0_17, %c0_18] : memref<16x128xf32, #tpu.memory_space<vmem>>, vector<16x128xf32>
    tpu.vector_store %arg8[%c0_17, %c0_18], %21 {strides = array<i32>} : memref<16x128xf32, #tpu.memory_space<vmem>>, vector<16x128xf32>,
    return
  }
  func.func @transform_0(%arg0: i32) -> (i32, i32) {
    %c0_i32 = arith.constant 0 : i32
    %c0_i32_0 = arith.constant 0 : i32
    return %arg0, %c0_i32 : i32, i32
  }
  func.func @transform_1(%arg0: i32) -> (i32, i32) {
    %c0_i32 = arith.constant 0 : i32
    %c0_i32_0 = arith.constant 0 : i32
    %c0_i32_1 = arith.constant 0 : i32
    return %c0_i32, %c0_i32_0 : i32, i32
  }
  func.func @transform_2(%arg0: i32) -> (i32, i32) {
    %c0_i32 = arith.constant 0 : i32
    %c0_i32_0 = arith.constant 0 : i32
    %c0_i32_1 = arith.constant 0 : i32
    return %c0_i32, %c0_i32_0 : i32, i32
  }
  func.func @transform_3(%arg0: i32) -> (i32, i32) {
    %c0_i32 = arith.constant 0 : i32
    %c0_i32_0 = arith.constant 0 : i32
    %c0_i32_1 = arith.constant 0 : i32
    return %c0_i32, %c0_i32_0 : i32, i32
  }
  func.func @transform_4(%arg0: i32) -> (i32, i32) {
    %c0_i32 = arith.constant 0 : i32
    %c0_i32_0 = arith.constant 0 : i32
    %c0_i32_1 = arith.constant 0 : i32
    return %c0_i32, %c0_i32_0 : i32, i32
  }
  func.func @transform_5(%arg0: i32) -> (i32, i32) {
    %c0_i32 = arith.constant 0 : i32
    %c0_i32_0 = arith.constant 0 : i32
    %c0_i32_1 = arith.constant 0 : i32
    return %c0_i32, %c0_i32_0 : i32, i32
  }
  func.func @transform_6(%arg0: i32) -> (i32, i32) {
    %c0_i32 = arith.constant 0 : i32
    %c0_i32_0 = arith.constant 0 : i32
    %c0_i32_1 = arith.constant 0 : i32
    return %c0_i32, %c0_i32_0 : i32, i32
  }
  func.func @transform_7(%arg0: i32) -> (i32, i32) {
    %c0_i32 = arith.constant 0 : i32
    %c0_i32_0 = arith.constant 0 : i32
    return %arg0, %c0_i32 : i32, i32
  }
}

</mosaic_0001>

<bundles_post_ra>
// kernel: tpu_custom_call.1
= control target key start
LH: loop header
LB: loop body
LE: loop exit
PB: predicated region body
PF: predicated region fallthrough
CT: control target
= control target key end

     0   :  { %12 = vsyncpa [#allocation3], 0  ;;  %s900_s0 = inlined_call_operand.hbm [shape: bf16[8,128], index: 0, kind: input, shape index: {}]   ;;  %s901_s1 = inlined_call_operand.hbm [shape: bf16[128,128], index: 1, kind: input, shape index: {}]   ;;  %s902_s2 = inlined_call_operand.vmem [shape: f32[1,128], index: 2, kind: input, shape index: {}]   ;;  %s903_s3 = inlined_call_operand.hbm [shape: bf16[128,128], index: 3, kind: input, shape index: {}]   ;;  %s904_s4 = inlined_call_operand.vmem [shape: f32[1,128], index: 4, kind: input, shape index: {}]   ;;  %s905_s5 = inlined_call_operand.hbm [shape: bf16[128,128], index: 5, kind: input, shape index: {}]   ;;  %s906_s6 = inlined_call_operand.vmem [shape: f32[1,128], index: 6, kind: input, shape index: {}]   ;;  %s907_s7 = inlined_call_operand.hbm [shape: f32[8,128], index: 7, kind: output, shape index: {}]  }
   0x1   :  { %13 = vsyncpa [#allocation6], 0 }
   0x2   :  { %14 = vsyncpa [#allocation9], 0 }
   0x3   :  { %15 = vsyncpa [#allocation4], 0 }
   0x4   :  { %20 = vsyncadd [#allocation3], 64  ;;  %s723_s24 = smov [#allocation5]   ;;  %s724_s26 = smov [#allocation2]  }
   0x5   :  { %s33_s25 = sshll.u32 %s723_s24, 4  ;;  %s21_s27 = sshll.u32 %s724_s26, 4  ;;  %s34_s25 = int_to_ptr.vmem [resolvable:$true] %s33_s25  ;;  %s774_s27 = int_to_ptr.vmem [resolvable:$true] %s21_s27 }
   0x6   :  { %s605_s30 = scalar_lea.hbm %s901_s1, 1024 }
   0x7   :  { %p606_p0 = scmp.ne.s32.totalorder %s901_s1, %s605_s30  ;;  %p609_p1 = scmp.lt.u32.totalorder %s605_s30, %s901_s1 }
   0x9   :  { %p611_p2 = pnand %p609_p1, %p606_p0 }
   0xb   :  { %614 = shalt.err (!%p611_p2)
}
   0xc   :  { %s615_s12 = scalar_lea.vmem %s34_s25, 1024  ;;  %p620_p4 = scmp.lt.s32.totalorder %s34_s25, %s34_s25 }
   0xd   :  { %p616_p3 = scmp.ne.s32.totalorder %s34_s25, %s615_s12  ;;  %p621_p5 = scmp.lt.s32.totalorder %s615_s12, %s615_s12 }
   0xf   :  { %p622_p6 = por %p621_p5, %p620_p4 }
  0x11   :  { %p623_p7 = pnand %p622_p6, %p616_p3 }
  0x13   :  { %626 = shalt.err (!%p623_p7)
}
  0x14   :  { %s725_s13 = smov 64   ;;  %s726_s14 = smov 4  }
  0x15   :  { %39 = dma.hbm_to_vmem [thread:$0]  %s901_s1, 1024, %s34_s25, [#allocation6], %s725_s13, %s725_s13, %s726_s14  }
  0x16   :  { %s627_s19 = scalar_lea.hbm %s900_s0, 64 }
  0x17   :  { %p628_p8 = scmp.ne.s32.totalorder %s900_s0, %s627_s19  ;;  %p631_p9 = scmp.lt.u32.totalorder %s627_s19, %s900_s0 }
  0x19   :  { %p633_p10 = pnand %p631_p9, %p628_p8 }
  0x1b   :  { %636 = shalt.err (!%p633_p10)
}
  0x1c   :  { %s637_s24 = scalar_lea.vmem %s774_s27, 64  ;;  %s641_s1 = scalar_lea.vmem %s774_s27, 128 }
  0x1d   :  { %p638_p11 = scmp.ne.s32.totalorder %s774_s27, %s637_s24  ;;  %p642_p12 = scmp.lt.s32.totalorder %s774_s27, %s774_s27 }
  0x1e   :  { %p643_p13 = scmp.lt.s32.totalorder %s641_s1, %s637_s24 }
  0x20   :  { %p644_p0 = por %p643_p13, %p642_p12 }
  0x22   :  { %p645_p1 = pnand %p644_p0, %p638_p11 }
  0x24   :  { %648 = shalt.err (!%p645_p1)
}
  0x25   :  { %27 = dma.hbm_to_vmem [thread:$0]  %s900_s0, 64, %s774_s27, [#allocation3], %s725_s13, %s725_s13, %s726_s14  }
  0x26   :  { %s727_s28 = smov [#allocation7]   ;;  %s728_s30 = smov [#allocation8]  }
  0x27   :  { %s47_s29 = sshll.u32 %s727_s28, 4  ;;  %s61_s8 = sshll.u32 %s728_s30, 4  ;;  %s48_s29 = int_to_ptr.vmem [resolvable:$true] %s47_s29  ;;  %s812_s8 = int_to_ptr.vmem [resolvable:$true] %s61_s8 }
  0x28   :  { %s649_s11 = scalar_lea.hbm %s903_s3, 1024 }
  0x29   :  { %p650_p2 = scmp.ne.s32.totalorder %s903_s3, %s649_s11  ;;  %p653_p3 = scmp.lt.u32.totalorder %s649_s11, %s903_s3 }
  0x2b   :  { %p655_p4 = pnand %p653_p3, %p650_p2 }
  0x2d   :  { %658 = shalt.err (!%p655_p4)
}
  0x2e   :  { %s659_s0 = scalar_lea.vmem %s48_s29, 1024  ;;  %p664_p6 = scmp.lt.s32.totalorder %s48_s29, %s48_s29 }
  0x2f   :  { %p660_p5 = scmp.ne.s32.totalorder %s48_s29, %s659_s0  ;;  %p665_p7 = scmp.lt.s32.totalorder %s659_s0, %s659_s0 }
  0x31   :  { %p666_p8 = por %p665_p7, %p664_p6 }
  0x33   :  { %p667_p9 = pnand %p666_p8, %p660_p5 }
  0x35   :  { %670 = shalt.err (!%p667_p9)
}
  0x36   :  { %53 = dma.hbm_to_vmem [thread:$0]  %s903_s3, 1024, %s48_s29, [#allocation6], %s725_s13, %s725_s13, %s726_s14  }
  0x37   :  { %s671_s21 = scalar_lea.hbm %s905_s5, 1024 }
  0x38   :  { %p672_p10 = scmp.ne.s32.totalorder %s905_s5, %s671_s21  ;;  %p675_p11 = scmp.lt.u32.totalorder %s671_s21, %s905_s5 }
  0x3a   :  { %p677_p12 = pnand %p675_p11, %p672_p10 }
  0x3c   :  { %680 = shalt.err (!%p677_p12)
}
  0x3d   :  { %s681_s25 = scalar_lea.vmem %s812_s8, 1024  ;;  %p686_p0 = scmp.lt.s32.totalorder %s812_s8, %s812_s8 }
  0x3e   :  { %p682_p13 = scmp.ne.s32.totalorder %s812_s8, %s681_s25  ;;  %p687_p1 = scmp.lt.s32.totalorder %s681_s25, %s681_s25 }
  0x40   :  { %p688_p2 = por %p687_p1, %p686_p0 }
  0x42   :  { %p689_p3 = pnand %p688_p2, %p682_p13 }
  0x44   :  { %692 = shalt.err (!%p689_p3)
}
  0x45   :  { %67 = dma.hbm_to_vmem [thread:$0]  %s905_s5, 1024, %s812_s8, [#allocation9], %s725_s13, %s725_s13, %s726_s14  }
  0x46   :  { %715 = dma.done.wait [#allocation3], 128  }
  0x47   :  { %716 = vsyncadd [#allocation3], 4294967168 }
  0x48   :  { %717 = dma.done.wait [#allocation6], 2048  }
  0x49   :  { %718 = vsyncadd [#allocation6], 4294965248 }
  0x4a   :  { %719 = dma.done.wait [#allocation9], 1024  }
  0x4b   :  { %720 = vsyncadd [#allocation9], 4294966272  ;;  %v729_v0 = vmov 0.0   ;;  %vm730_vm0 = vmmov 0   ;;  %v580_v1 = vld [vmem:[#allocation5] sm:$0xff]   ;;  %v581_v2 = vld [vmem:[#allocation5 + $0x8] sm:$0xff]  }
  0x4c   :  { %509 = vmatprep.subr.bf16.mxu0 %v729_v0  ;;  %525 = vmatprep.mubr.msk.bf16.mxu0 %vm730_vm0, %v729_v0  ;;  %v582_v3 = vld [vmem:[#allocation5 + $0x10] sm:$0xff]   ;;  %v589_v4 = vld [vmem:[#allocation7] sm:$0xff]   ;;  %v583_v5 = vld [vmem:[#allocation5 + $0x18] sm:$0xff]  }
  0x4d   :  { %529 = vmatprep.subr.bf16.mxu1 %v729_v0  ;;  %545 = vmatprep.mubr.msk.bf16.mxu1 %vm730_vm0, %v729_v0  ;;  %v590_v6 = vld [vmem:[#allocation7 + $0x8] sm:$0xff]   ;;  %v584_v7 = vld [vmem:[#allocation5 + $0x20] sm:$0xff]   ;;  %v591_v8 = vld [vmem:[#allocation7 + $0x10] sm:$0xff]  }
  0x4e   :  { %510 = vmatpush3.bf16.msra.mxu0 %v580_v1  ;;  %530 = vmatpush3.bf16.msra.mxu1 %v589_v4  ;;  %v585_v9 = vld [vmem:[#allocation5 + $0x28] sm:$0xff]   ;;  %v592_v10 = vld [vmem:[#allocation7 + $0x18] sm:$0xff]   ;;  %v586_v11 = vld [vmem:[#allocation5 + $0x30] sm:$0xff]  }
  0x4f   :  { %511 = vmatprep.subr.bf16.mxu0 %v729_v0  ;;  %531 = vmatprep.subr.bf16.mxu1 %v729_v0  ;;  %v593_v12 = vld [vmem:[#allocation7 + $0x20] sm:$0xff]   ;;  %v587_v13 = vld [vmem:[#allocation5 + $0x38] sm:$0xff]   ;;  %v594_v14 = vld [vmem:[#allocation7 + $0x28] sm:$0xff]  }
  0x50   :  { %v588_v15 = vld [vmem:[#allocation2] sm:$0xff]   ;;  %v595_v16 = vld [vmem:[#allocation7 + $0x30] sm:$0xff]   ;;  %v597_v18 = vld [vmem:[#allocation8] sm:$0xff]  }
  0x51   :  { %v596_v17 = vld [vmem:[#allocation7 + $0x38] sm:$0xff]   ;;  %v598_v19 = vld [vmem:[#allocation8 + $0x8] sm:$0xff]   ;;  %v599_v20 = vld [vmem:[#allocation8 + $0x10] sm:$0xff]  }
  0x52   :  { %512 = vmatpush3.bf16.msra.mxu0 %v581_v2  ;;  %532 = vmatpush3.bf16.msra.mxu1 %v590_v6  ;;  %v600_v21 = vld [vmem:[#allocation8 + $0x18] sm:$0xff]   ;;  %v601_v22 = vld [vmem:[#allocation8 + $0x20] sm:$0xff]   ;;  %v602_v23 = vld [vmem:[#allocation8 + $0x28] sm:$0xff]  }
  0x53   :  { %513 = vmatprep.subr.bf16.mxu0 %v729_v0  ;;  %533 = vmatprep.subr.bf16.mxu1 %v729_v0  ;;  %v454_v24 = vld [vmem:[%s902_s2] ss:$0 sm:$0xff]  ;;  %v603_v34 = vld [vmem:[#allocation8 + $0x30] sm:$0xff]  }
  0x54   :  { %v604_v35 = vld [vmem:[#allocation8 + $0x38] sm:$0xff]  }
  0x55   :  { %v464_v36 = vld [vmem:[%s904_s4] ss:$0 sm:$0xff] }
  0x56   :  { %514 = vmatpush3.bf16.msra.mxu0 %v582_v3  ;;  %534 = vmatpush3.bf16.msra.mxu1 %v591_v8  ;;  %v473_v46 = vld [vmem:[%s906_s6] ss:$0 sm:$0xff] }
  0x57   :  { %515 = vmatprep.subr.bf16.mxu0 %v729_v0  ;;  %535 = vmatprep.subr.bf16.mxu1 %v729_v0 }
  0x5a   :  { %516 = vmatpush3.bf16.msra.mxu0 %v583_v5  ;;  %536 = vmatpush3.bf16.msra.mxu1 %v592_v10 }
  0x5b   :  { %517 = vmatprep.subr.bf16.mxu0 %v729_v0  ;;  %537 = vmatprep.subr.bf16.mxu1 %v729_v0 }
  0x5e   :  { %518 = vmatpush3.bf16.msra.mxu0 %v584_v7  ;;  %538 = vmatpush3.bf16.msra.mxu1 %v593_v12 }
  0x5f   :  { %519 = vmatprep.subr.bf16.mxu0 %v729_v0  ;;  %539 = vmatprep.subr.bf16.mxu1 %v729_v0 }
  0x62   :  { %520 = vmatpush3.bf16.msra.mxu0 %v585_v9  ;;  %540 = vmatpush3.bf16.msra.mxu1 %v594_v14 }
  0x63   :  { %521 = vmatprep.subr.bf16.mxu0 %v729_v0  ;;  %541 = vmatprep.subr.bf16.mxu1 %v729_v0 }
  0x66   :  { %522 = vmatpush3.bf16.msra.mxu0 %v586_v11  ;;  %542 = vmatpush3.bf16.msra.mxu1 %v595_v16 }
  0x67   :  { %523 = vmatprep.subr.bf16.mxu0 %v729_v0  ;;  %543 = vmatprep.subr.bf16.mxu1 %v729_v0 }
  0x6a   :  { %524 = vmatpush3.bf16.msra.mxu0 %v587_v13  ;;  %544 = vmatpush3.bf16.msra.mxu1 %v596_v17 }
  0x6b   :  { %549 = vmatprep.subr.bf16.mxu0 %v729_v0 }
  0x6d   :  { %526 = vmatmul.mubr.bf16.vlgmr.msra.gmra.mrb[0].mxu0 %v588_v15 }
  0x6e   :  { %565 = vmatprep.mubr.msk.bf16.mxu0 %vm730_vm0, %v729_v0  ;;  %550 = vmatpush3.bf16.msra.mxu0 %v597_v18 }
  0x6f   :  { %551 = vmatprep.subr.bf16.mxu0 %v729_v0 }
  0x72   :  { %552 = vmatpush3.bf16.msra.mxu0 %v598_v19 }
  0x73   :  { %553 = vmatprep.subr.bf16.mxu0 %v729_v0 }
  0x76   :  { %554 = vmatpush3.bf16.msra.mxu0 %v599_v20 }
  0x77   :  { %555 = vmatprep.subr.bf16.mxu0 %v729_v0 }
  0x7a   :  { %556 = vmatpush3.bf16.msra.mxu0 %v600_v21 }
  0x7b   :  { %557 = vmatprep.subr.bf16.mxu0 %v729_v0 }
  0x7e   :  { %558 = vmatpush3.bf16.msra.mxu0 %v601_v22 }
  0x7f   :  { %559 = vmatprep.subr.bf16.mxu0 %v729_v0 }
  0x82   :  { %560 = vmatpush3.bf16.msra.mxu0 %v602_v23 }
  0x83   :  { %561 = vmatprep.subr.bf16.mxu0 %v729_v0 }
  0x86   :  { %562 = vmatpush3.bf16.msra.mxu0 %v603_v34 }
  0x87   :  { %563 = vmatprep.subr.bf16.mxu0 %v729_v0 }
  0x8a   :  { %564 = vmatpush3.bf16.msra.mxu0 %v604_v35 }
 0x140   :  { %v196_v25 = vpop.f32.mrb[0].mxu0 }
 0x141   :  { %v197_v26 = vadd.f32 %v454_v24, %v196_v25  ;;  %v527_v27 = vpop.f32.mrb[1].mxu0 }
 0x142   :  { %v199_v28 = vpop.f32.mrb[2].mxu0 }
 0x143   :  { %v200_v29 = vadd.f32 %v454_v24, %v199_v28  ;;  %v528_v30 = vpop.f32.mrb[3].mxu0  ;;  %v203_v31 = vmax.f32 %v197_v26, 0.0 }
 0x145   :  { %v204_v32 = vmax.f32 %v200_v29, 0.0 }
 0x147   :  { %v205_v33 = vpack.c.bf16 %v204_v32, %v203_v31 }
 0x149   :  { %546 = vmatmul.mubr.bf16.vlgmr.msra.gmra.mrb[0].mxu1 %v205_v33 }
 0x21c   :  { %v311_v37 = vpop.f32.mrb[0].mxu1 }
 0x21d   :  { %v312_v38 = vadd.f32 %v464_v36, %v311_v37  ;;  %v547_v39 = vpop.f32.mrb[1].mxu1 }
 0x21e   :  { %v314_v40 = vpop.f32.mrb[2].mxu1 }
 0x21f   :  { %v315_v41 = vadd.f32 %v464_v36, %v314_v40  ;;  %v548_v42 = vpop.f32.mrb[3].mxu1  ;;  %v318_v43 = vmax.f32 %v312_v38, 0.0 }
 0x221   :  { %v319_v44 = vmax.f32 %v315_v41, 0.0 }
 0x223   :  { %v320_v45 = vpack.c.bf16 %v319_v44, %v318_v43 }
 0x225   :  { %566 = vmatmul.mubr.bf16.vlgmr.msra.gmra.mrb[4].mxu0 %v320_v45 }
 0x2f8   :  { %v426_v47 = vpop.f32.mrb[4].mxu0 }
 0x2f9   :  { %v427_v48 = vadd.f32 %v473_v46, %v426_v47  ;;  %v567_v49 = vpop.f32.mrb[5].mxu0 }
 0x2fa   :  { %v429_v50 = vpop.f32.mrb[6].mxu0 }
 0x2fb   :  { %433 = vst [vmem:[#allocation10] sm:$0xff] %v427_v48  ;;  %v430_v51 = vadd.f32 %v473_v46, %v429_v50  ;;  %v568_v52 = vpop.f32.mrb[7].mxu0 }
 0x2fd   :  { %434 = vst [vmem:[#allocation10 + $0x8] sm:$0xff] %v430_v51 }
 0x2fe   :  { %439 = vsyncadd [#allocation4], 128  ;;  %s731_s4 = smov [#allocation10]  }
 0x2ff   :  { %s440_s30 = sshll.u32 %s731_s4, 4  ;;  %s441_s30 = int_to_ptr.vmem [resolvable:$true] %s440_s30 }
 0x300   :  { %s693_s8 = scalar_lea.vmem %s441_s30, 128  ;;  %s697_s9 = scalar_lea.vmem %s441_s30, 256 }
 0x301   :  { %p694_p4 = scmp.ne.s32.totalorder %s441_s30, %s693_s8  ;;  %p698_p5 = scmp.lt.s32.totalorder %s441_s30, %s441_s30 }
 0x302   :  { %p699_p6 = scmp.lt.s32.totalorder %s697_s9, %s693_s8 }
 0x304   :  { %p700_p7 = por %p699_p6, %p698_p5 }
 0x306   :  { %p701_p8 = pnand %p700_p7, %p694_p4 }
 0x308   :  { %704 = shalt.err (!%p701_p8)
}
 0x309   :  { %s705_s11 = scalar_lea.hbm %s907_s7, 128 }
 0x30a   :  { %p706_p9 = scmp.ne.s32.totalorder %s907_s7, %s705_s11  ;;  %p709_p10 = scmp.lt.u32.totalorder %s705_s11, %s907_s7 }
 0x30c   :  { %p711_p11 = pnand %p709_p10, %p706_p9 }
 0x30e   :  { %714 = shalt.err (!%p711_p11)
}
 0x30f   :  { %s732_s0 = smov 128   ;;  %s733_s27 = smov 8  }
 0x310   :  { %446 = dma.vmem_to_hbm [thread:$0]  %s441_s30, 128, %s907_s7, [#allocation4], %s732_s0, %s732_s0, %s733_s27  }
 0x311   :  { %721 = dma.done.wait [#allocation4], 256  }
 0x312   :  { %722 = vsyncadd [#allocation4], 4294967040 }
 0x313   :  { %450 = vsyncpa [#allocation3], 1 }
 0x314   :  { %451 = vsyncpa [#allocation6], 1 }
 0x315   :  { %452 = vsyncpa [#allocation9], 1 }
 0x316   :  { %453 = vsyncpa [#allocation4], 1 }

// kernel: tpu_custom_call.1
= control target key start
LH: loop header
LB: loop body
LE: loop exit
PB: predicated region body
PF: predicated region fallthrough
CT: control target
= control target key end

     0   :  { %12 = vsyncpa [#allocation3], 0  ;;  %s900_s0 = inlined_call_operand.hbm [shape: bf16[8,128], index: 0, kind: input, shape index: {}]   ;;  %s901_s1 = inlined_call_operand.hbm [shape: bf16[128,128], index: 1, kind: input, shape index: {}]   ;;  %s902_s2 = inlined_call_operand.vmem [shape: f32[1,128], index: 2, kind: input, shape index: {}]   ;;  %s903_s3 = inlined_call_operand.hbm [shape: bf16[128,128], index: 3, kind: input, shape index: {}]   ;;  %s904_s4 = inlined_call_operand.vmem [shape: f32[1,128], index: 4, kind: input, shape index: {}]   ;;  %s905_s5 = inlined_call_operand.hbm [shape: bf16[128,128], index: 5, kind: input, shape index: {}]   ;;  %s906_s6 = inlined_call_operand.vmem [shape: f32[1,128], index: 6, kind: input, shape index: {}]   ;;  %s907_s7 = inlined_call_operand.hbm [shape: f32[8,128], index: 7, kind: output, shape index: {}]  }
   0x1   :  { %13 = vsyncpa [#allocation6], 0 }
   0x2   :  { %14 = vsyncpa [#allocation9], 0 }
   0x3   :  { %15 = vsyncpa [#allocation4], 0 }
   0x4   :  { %20 = vsyncadd [#allocation3], 64  ;;  %s723_s24 = smov [#allocation5]   ;;  %s724_s26 = smov [#allocation2]  }
   0x5   :  { %s33_s25 = sshll.u32 %s723_s24, 4  ;;  %s21_s27 = sshll.u32 %s724_s26, 4  ;;  %s34_s25 = int_to_ptr.vmem [resolvable:$true] %s33_s25  ;;  %s774_s27 = int_to_ptr.vmem [resolvable:$true] %s21_s27 }
   0x6   :  { %s605_s30 = scalar_lea.hbm %s901_s1, 1024 }
   0x7   :  { %p606_p0 = scmp.ne.s32.totalorder %s901_s1, %s605_s30  ;;  %p609_p1 = scmp.lt.u32.totalorder %s605_s30, %s901_s1 }
   0x9   :  { %p611_p2 = pnand %p609_p1, %p606_p0 }
   0xb   :  { %614 = shalt.err (!%p611_p2)
}
   0xc   :  { %s615_s12 = scalar_lea.vmem %s34_s25, 1024  ;;  %p620_p4 = scmp.lt.s32.totalorder %s34_s25, %s34_s25 }
   0xd   :  { %p616_p3 = scmp.ne.s32.totalorder %s34_s25, %s615_s12  ;;  %p621_p5 = scmp.lt.s32.totalorder %s615_s12, %s615_s12 }
   0xf   :  { %p622_p6 = por %p621_p5, %p620_p4 }
  0x11   :  { %p623_p7 = pnand %p622_p6, %p616_p3 }
  0x13   :  { %626 = shalt.err (!%p623_p7)
}
  0x14   :  { %s725_s13 = smov 64   ;;  %s726_s14 = smov 4  }
  0x15   :  { %39 = dma.hbm_to_vmem [thread:$0]  %s901_s1, 1024, %s34_s25, [#allocation6], %s725_s13, %s725_s13, %s726_s14  }
  0x16   :  { %s627_s19 = scalar_lea.hbm %s900_s0, 64 }
  0x17   :  { %p628_p8 = scmp.ne.s32.totalorder %s900_s0, %s627_s19  ;;  %p631_p9 = scmp.lt.u32.totalorder %s627_s19, %s900_s0 }
  0x19   :  { %p633_p10 = pnand %p631_p9, %p628_p8 }
  0x1b   :  { %636 = shalt.err (!%p633_p10)
}
  0x1c   :  { %s637_s24 = scalar_lea.vmem %s774_s27, 64  ;;  %s641_s1 = scalar_lea.vmem %s774_s27, 128 }
  0x1d   :  { %p638_p11 = scmp.ne.s32.totalorder %s774_s27, %s637_s24  ;;  %p642_p12 = scmp.lt.s32.totalorder %s774_s27, %s774_s27 }
  0x1e   :  { %p643_p13 = scmp.lt.s32.totalorder %s641_s1, %s637_s24 }
  0x20   :  { %p644_p0 = por %p643_p13, %p642_p12 }
  0x22   :  { %p645_p1 = pnand %p644_p0, %p638_p11 }
  0x24   :  { %648 = shalt.err (!%p645_p1)
}
  0x25   :  { %27 = dma.hbm_to_vmem [thread:$0]  %s900_s0, 64, %s774_s27, [#allocation3], %s725_s13, %s725_s13, %s726_s14  }
  0x26   :  { %s727_s28 = smov [#allocation7]   ;;  %s728_s30 = smov [#allocation8]  }
  0x27   :  { %s47_s29 = sshll.u32 %s727_s28, 4  ;;  %s61_s8 = sshll.u32 %s728_s30, 4  ;;  %s48_s29 = int_to_ptr.vmem [resolvable:$true] %s47_s29  ;;  %s812_s8 = int_to_ptr.vmem [resolvable:$true] %s61_s8 }
  0x28   :  { %s649_s11 = scalar_lea.hbm %s903_s3, 1024 }
  0x29   :  { %p650_p2 = scmp.ne.s32.totalorder %s903_s3, %s649_s11  ;;  %p653_p3 = scmp.lt.u32.totalorder %s649_s11, %s903_s3 }
  0x2b   :  { %p655_p4 = pnand %p653_p3, %p650_p2 }
  0x2d   :  { %658 = shalt.err (!%p655_p4)
}
  0x2e   :  { %s659_s0 = scalar_lea.vmem %s48_s29, 1024  ;;  %p664_p6 = scmp.lt.s32.totalorder %s48_s29, %s48_s29 }
  0x2f   :  { %p660_p5 = scmp.ne.s32.totalorder %s48_s29, %s659_s0  ;;  %p665_p7 = scmp.lt.s32.totalorder %s659_s0, %s659_s0 }
  0x31   :  { %p666_p8 = por %p665_p7, %p664_p6 }
  0x33   :  { %p667_p9 = pnand %p666_p8, %p660_p5 }
  0x35   :  { %670 = shalt.err (!%p667_p9)
}
  0x36   :  { %53 = dma.hbm_to_vmem [thread:$0]  %s903_s3, 1024, %s48_s29, [#allocation6], %s725_s13, %s725_s13, %s726_s14  }
  0x37   :  { %s671_s21 = scalar_lea.hbm %s905_s5, 1024 }
  0x38   :  { %p672_p10 = scmp.ne.s32.totalorder %s905_s5, %s671_s21  ;;  %p675_p11 = scmp.lt.u32.totalorder %s671_s21, %s905_s5 }
  0x3a   :  { %p677_p12 = pnand %p675_p11, %p672_p10 }
  0x3c   :  { %680 = shalt.err (!%p677_p12)
}
  0x3d   :  { %s681_s25 = scalar_lea.vmem %s812_s8, 1024  ;;  %p686_p0 = scmp.lt.s32.totalorder %s812_s8, %s812_s8 }
  0x3e   :  { %p682_p13 = scmp.ne.s32.totalorder %s812_s8, %s681_s25  ;;  %p687_p1 = scmp.lt.s32.totalorder %s681_s25, %s681_s25 }
  0x40   :  { %p688_p2 = por %p687_p1, %p686_p0 }
  0x42   :  { %p689_p3 = pnand %p688_p2, %p682_p13 }
  0x44   :  { %692 = shalt.err (!%p689_p3)
}
  0x45   :  { %67 = dma.hbm_to_vmem [thread:$0]  %s905_s5, 1024, %s812_s8, [#allocation9], %s725_s13, %s725_s13, %s726_s14  }
  0x46   :  { %715 = dma.done.wait [#allocation3], 128  }
  0x47   :  { %716 = vsyncadd [#allocation3], 4294967168 }
  0x48   :  { %717 = dma.done.wait [#allocation6], 2048  }
  0x49   :  { %718 = vsyncadd [#allocation6], 4294965248 }
  0x4a   :  { %719 = dma.done.wait [#allocation9], 1024  }
  0x4b   :  { %720 = vsyncadd [#allocation9], 4294966272  ;;  %v729_v0 = vmov 0.0   ;;  %vm730_vm0 = vmmov 0   ;;  %v580_v1 = vld [vmem:[#allocation5] sm:$0xff]   ;;  %v581_v2 = vld [vmem:[#allocation5 + $0x8] sm:$0xff]  }
  0x4c   :  { %509 = vmatprep.subr.bf16.mxu0 %v729_v0  ;;  %525 = vmatprep.mubr.msk.bf16.mxu0 %vm730_vm0, %v729_v0  ;;  %v582_v3 = vld [vmem:[#allocation5 + $0x10] sm:$0xff]   ;;  %v589_v4 = vld [vmem:[#allocation7] sm:$0xff]   ;;  %v583_v5 = vld [vmem:[#allocation5 + $0x18] sm:$0xff]  }
  0x4d   :  { %529 = vmatprep.subr.bf16.mxu1 %v729_v0  ;;  %545 = vmatprep.mubr.msk.bf16.mxu1 %vm730_vm0, %v729_v0  ;;  %v590_v6 = vld [vmem:[#allocation7 + $0x8] sm:$0xff]   ;;  %v584_v7 = vld [vmem:[#allocation5 + $0x20] sm:$0xff]   ;;  %v591_v8 = vld [vmem:[#allocation7 + $0x10] sm:$0xff]  }
  0x4e   :  { %510 = vmatpush3.bf16.msra.mxu0 %v580_v1  ;;  %530 = vmatpush3.bf16.msra.mxu1 %v589_v4  ;;  %v585_v9 = vld [vmem:[#allocation5 + $0x28] sm:$0xff]   ;;  %v592_v10 = vld [vmem:[#allocation7 + $0x18] sm:$0xff]   ;;  %v586_v11 = vld [vmem:[#allocation5 + $0x30] sm:$0xff]  }
  0x4f   :  { %511 = vmatprep.subr.bf16.mxu0 %v729_v0  ;;  %531 = vmatprep.subr.bf16.mxu1 %v729_v0  ;;  %v593_v12 = vld [vmem:[#allocation7 + $0x20] sm:$0xff]   ;;  %v587_v13 = vld [vmem:[#allocation5 + $0x38] sm:$0xff]   ;;  %v594_v14 = vld [vmem:[#allocation7 + $0x28] sm:$0xff]  }
  0x50   :  { %v588_v15 = vld [vmem:[#allocation2] sm:$0xff]   ;;  %v595_v16 = vld [vmem:[#allocation7 + $0x30] sm:$0xff]   ;;  %v597_v18 = vld [vmem:[#allocation8] sm:$0xff]  }
  0x51   :  { %v596_v17 = vld [vmem:[#allocation7 + $0x38] sm:$0xff]   ;;  %v598_v19 = vld [vmem:[#allocation8 + $0x8] sm:$0xff]   ;;  %v599_v20 = vld [vmem:[#allocation8 + $0x10] sm:$0xff]  }
  0x52   :  { %512 = vmatpush3.bf16.msra.mxu0 %v581_v2  ;;  %532 = vmatpush3.bf16.msra.mxu1 %v590_v6  ;;  %v600_v21 = vld [vmem:[#allocation8 + $0x18] sm:$0xff]   ;;  %v601_v22 = vld [vmem:[#allocation8 + $0x20] sm:$0xff]   ;;  %v602_v23 = vld [vmem:[#allocation8 + $0x28] sm:$0xff]  }
  0x53   :  { %513 = vmatprep.subr.bf16.mxu0 %v729_v0  ;;  %533 = vmatprep.subr.bf16.mxu1 %v729_v0  ;;  %v454_v24 = vld [vmem:[%s902_s2] ss:$0 sm:$0xff]  ;;  %v603_v34 = vld [vmem:[#allocation8 + $0x30] sm:$0xff]  }
  0x54   :  { %v604_v35 = vld [vmem:[#allocation8 + $0x38] sm:$0xff]  }
  0x55   :  { %v464_v36 = vld [vmem:[%s904_s4] ss:$0 sm:$0xff] }
  0x56   :  { %514 = vmatpush3.bf16.msra.mxu0 %v582_v3  ;;  %534 = vmatpush3.bf16.msra.mxu1 %v591_v8  ;;  %v473_v46 = vld [vmem:[%s906_s6] ss:$0 sm:$0xff] }
  0x57   :  { %515 = vmatprep.subr.bf16.mxu0 %v729_v0  ;;  %535 = vmatprep.subr.bf16.mxu1 %v729_v0 }
  0x5a   :  { %516 = vmatpush3.bf16.msra.mxu0 %v583_v5  ;;  %536 = vmatpush3.bf16.msra.mxu1 %v592_v10 }
  0x5b   :  { %517 = vmatprep.subr.bf16.mxu0 %v729_v0  ;;  %537 = vmatprep.subr.bf16.mxu1 %v729_v0 }
  0x5e   :  { %518 = vmatpush3.bf16.msra.mxu0 %v584_v7  ;;  %538 = vmatpush3.bf16.msra.mxu1 %v593_v12 }
  0x5f   :  { %519 = vmatprep.subr.bf16.mxu0 %v729_v0  ;;  %539 = vmatprep.subr.bf16.mxu1 %v729_v0 }
  0x62   :  { %520 = vmatpush3.bf16.msra.mxu0 %v585_v9  ;;  %540 = vmatpush3.bf16.msra.mxu1 %v594_v14 }
  0x63   :  { %521 = vmatprep.subr.bf16.mxu0 %v729_v0  ;;  %541 = vmatprep.subr.bf16.mxu1 %v729_v0 }
  0x66   :  { %522 = vmatpush3.bf16.msra.mxu0 %v586_v11  ;;  %542 = vmatpush3.bf16.msra.mxu1 %v595_v16 }
  0x67   :  { %523 = vmatprep.subr.bf16.mxu0 %v729_v0  ;;  %543 = vmatprep.subr.bf16.mxu1 %v729_v0 }
  0x6a   :  { %524 = vmatpush3.bf16.msra.mxu0 %v587_v13  ;;  %544 = vmatpush3.bf16.msra.mxu1 %v596_v17 }
  0x6b   :  { %549 = vmatprep.subr.bf16.mxu0 %v729_v0 }
  0x6d   :  { %526 = vmatmul.mubr.bf16.vlgmr.msra.gmra.mrb[0].mxu0 %v588_v15 }
  0x6e   :  { %565 = vmatprep.mubr.msk.bf16.mxu0 %vm730_vm0, %v729_v0  ;;  %550 = vmatpush3.bf16.msra.mxu0 %v597_v18 }
  0x6f   :  { %551 = vmatprep.subr.bf16.mxu0 %v729_v0 }
  0x72   :  { %552 = vmatpush3.bf16.msra.mxu0 %v598_v19 }
  0x73   :  { %553 = vmatprep.subr.bf16.mxu0 %v729_v0 }
  0x76   :  { %554 = vmatpush3.bf16.msra.mxu0 %v599_v20 }
  0x77   :  { %555 = vmatprep.subr.bf16.mxu0 %v729_v0 }
  0x7a   :  { %556 = vmatpush3.bf16.msra.mxu0 %v600_v21 }
  0x7b   :  { %557 = vmatprep.subr.bf16.mxu0 %v729_v0 }
  0x7e   :  { %558 = vmatpush3.bf16.msra.mxu0 %v601_v22 }
  0x7f   :  { %559 = vmatprep.subr.bf16.mxu0 %v729_v0 }
  0x82   :  { %560 = vmatpush3.bf16.msra.mxu0 %v602_v23 }
  0x83   :  { %561 = vmatprep.subr.bf16.mxu0 %v729_v0 }
  0x86   :  { %562 = vmatpush3.bf16.msra.mxu0 %v603_v34 }
  0x87   :  { %563 = vmatprep.subr.bf16.mxu0 %v729_v0 }
  0x8a   :  { %564 = vmatpush3.bf16.msra.mxu0 %v604_v35 }
 0x140   :  { %v196_v25 = vpop.f32.mrb[0].mxu0 }
 0x141   :  { %v197_v26 = vadd.f32 %v454_v24, %v196_v25  ;;  %v527_v27 = vpop.f32.mrb[1].mxu0 }
 0x142   :  { %v199_v28 = vpop.f32.mrb[2].mxu0 }
 0x143   :  { %v200_v29 = vadd.f32 %v454_v24, %v199_v28  ;;  %v528_v30 = vpop.f32.mrb[3].mxu0  ;;  %v203_v31 = vmax.f32 %v197_v26, 0.0 }
 0x145   :  { %v204_v32 = vmax.f32 %v200_v29, 0.0 }
 0x147   :  { %v205_v33 = vpack.c.bf16 %v204_v32, %v203_v31 }
 0x149   :  { %546 = vmatmul.mubr.bf16.vlgmr.msra.gmra.mrb[0].mxu1 %v205_v33 }
 0x21c   :  { %v311_v37 = vpop.f32.mrb[0].mxu1 }
 0x21d   :  { %v312_v38 = vadd.f32 %v464_v36, %v311_v37  ;;  %v547_v39 = vpop.f32.mrb[1].mxu1 }
 0x21e   :  { %v314_v40 = vpop.f32.mrb[2].mxu1 }
 0x21f   :  { %v315_v41 = vadd.f32 %v464_v36, %v314_v40  ;;  %v548_v42 = vpop.f32.mrb[3].mxu1  ;;  %v318_v43 = vmax.f32 %v312_v38, 0.0 }
 0x221   :  { %v319_v44 = vmax.f32 %v315_v41, 0.0 }
 0x223   :  { %v320_v45 = vpack.c.bf16 %v319_v44, %v318_v43 }
 0x225   :  { %566 = vmatmul.mubr.bf16.vlgmr.msra.gmra.mrb[4].mxu0 %v320_v45 }
 0x2f8   :  { %v426_v47 = vpop.f32.mrb[4].mxu0 }
 0x2f9   :  { %v427_v48 = vadd.f32 %v473_v46, %v426_v47  ;;  %v567_v49 = vpop.f32.mrb[5].mxu0 }
 0x2fa   :  { %v429_v50 = vpop.f32.mrb[6].mxu0 }
 0x2fb   :  { %433 = vst [vmem:[#allocation10] sm:$0xff] %v427_v48  ;;  %v430_v51 = vadd.f32 %v473_v46, %v429_v50  ;;  %v568_v52 = vpop.f32.mrb[7].mxu0 }
 0x2fd   :  { %434 = vst [vmem:[#allocation10 + $0x8] sm:$0xff] %v430_v51 }
 0x2fe   :  { %439 = vsyncadd [#allocation4], 128  ;;  %s731_s4 = smov [#allocation10]  }
 0x2ff   :  { %s440_s30 = sshll.u32 %s731_s4, 4  ;;  %s441_s30 = int_to_ptr.vmem [resolvable:$true] %s440_s30 }
 0x300   :  { %s693_s8 = scalar_lea.vmem %s441_s30, 128  ;;  %s697_s9 = scalar_lea.vmem %s441_s30, 256 }
 0x301   :  { %p694_p4 = scmp.ne.s32.totalorder %s441_s30, %s693_s8  ;;  %p698_p5 = scmp.lt.s32.totalorder %s441_s30, %s441_s30 }
 0x302   :  { %p699_p6 = scmp.lt.s32.totalorder %s697_s9, %s693_s8 }
 0x304   :  { %p700_p7 = por %p699_p6, %p698_p5 }
 0x306   :  { %p701_p8 = pnand %p700_p7, %p694_p4 }
 0x308   :  { %704 = shalt.err (!%p701_p8)
}
 0x309   :  { %s705_s11 = scalar_lea.hbm %s907_s7, 128 }
 0x30a   :  { %p706_p9 = scmp.ne.s32.totalorder %s907_s7, %s705_s11  ;;  %p709_p10 = scmp.lt.u32.totalorder %s705_s11, %s907_s7 }
 0x30c   :  { %p711_p11 = pnand %p709_p10, %p706_p9 }
 0x30e   :  { %714 = shalt.err (!%p711_p11)
}
 0x30f   :  { %s732_s0 = smov 128   ;;  %s733_s27 = smov 8  }
 0x310   :  { %446 = dma.vmem_to_hbm [thread:$0]  %s441_s30, 128, %s907_s7, [#allocation4], %s732_s0, %s732_s0, %s733_s27  }
 0x311   :  { %721 = dma.done.wait [#allocation4], 256  }
 0x312   :  { %722 = vsyncadd [#allocation4], 4294967040 }
 0x313   :  { %450 = vsyncpa [#allocation3], 1 }
 0x314   :  { %451 = vsyncpa [#allocation6], 1 }
 0x315   :  { %452 = vsyncpa [#allocation9], 1 }
 0x316   :  { %453 = vsyncpa [#allocation4], 1 }

</bundles_post_ra>
